<compile_context>
chip_gen: v6e
topology: v6e:2x2x1
jax: 0.10.0
libtpu: 0.0.40
codegen_flags: <defaults>
</compile_context>

<pallas_src>
import math
import jax
import jax.numpy as jnp
import numpy as np
from jax.experimental import pallas as pl
from jax.experimental.pallas import tpu as pltpu

# ---------------- configuration (mirrors module defaults, small shapes) ----------------
VEC_IN = 4
REL_IN = 4
EMB = 32            # emb_size
HID = 32            # single hidden layer (32,) for each FCNetwork
HEADS = 4           # attention_heads
HEAD_DIM = EMB // HEADS
OUT_SIZES = (2, 2)  # output_sizes
OUT_TOTAL = sum(OUT_SIZES)
BATCH = 2
SEQ = 8

F32 = jnp.float32

# ---------------- packed activation layout (wrapper-built, rows x 8 cols) ----------------
IN_COLS = 8
ONES_COL = max(VEC_IN, REL_IN)            # column 4 carries the bias "1"
ROWS_VALID = BATCH * SEQ + BATCH          # buffer rows first (0:16), vector rows next (16:18)
ROWS_PAD = ((ROWS_VALID + 7) // 8) * 8    # 24 (sublane aligned)

# ---------------- packed parameter slab layout (rows x 128 lanes, f32) ------------------
SLAB_W = 4 * EMB     # 128 lanes
R_SEG = 0            # (HEADS, EMB)       head-segment mask (precomputed)
R_W1 = 8             # (IN_COLS, 2*HID)   [w1v | w1r]; row ONES_COL = [b1v | b1r]
R_W2 = 16            # (2*HID, 4*EMB)     block-diag [[whv | whv@wq*s, 0], [0, whr@wk | whr@wv]]
R_B2 = 80            # (1, 4*EMB)         [0 | (bhv@wq+bq)*s | bhr@wk+bk | bhr@wv+bv]
R_WC = 88            # (2*EMB, HID)       [wcv ; wo@wca]   (MHA out-proj folded in)
R_BC = 152           # (1, HID)           bc + bo@wca + bhv@wcv
R_WOUT = 160         # (HID, OUT_TOTAL)   [wo1 | wo2]
R_BOUT = 192         # (1, OUT_TOTAL)     [bo1 | bo2]
SLAB_ROWS = 200


# ----------------------------------- Pallas kernel --------------------------------------
def attention_net_kernel(x_ref, p_ref, out_ref):
    B, S, H, E, hd = BATCH, SEQ, HEADS, EMB, HEAD_DIM
    BS = B * S

    # packed parameters: static slices of the single VMEM slab (free)
    seg = p_ref[R_SEG:R_SEG + H, :E]                     # (H, E) head-segment mask
    w1 = p_ref[R_W1:R_W1 + IN_COLS, :2 * HID]            # (8, 64)
    w2 = p_ref[R_W2:R_W2 + 2 * HID, :4 * E]              # (64, 128) block-diagonal
    b2 = p_ref[R_B2:R_B2 + 1, :4 * E]                    # (1, 128)
    wc = p_ref[R_WC:R_WC + 2 * E, :HID]                  # (64, 32)
    bc = p_ref[R_BC:R_BC + 1, :HID]                      # (1, 32)
    wout = p_ref[R_WOUT:R_WOUT + HID, :OUT_TOTAL]        # (32, 4)
    bout = p_ref[R_BOUT:R_BOUT + 1, :OUT_TOTAL]          # (1, 4)

    # ---- layer 1: both MLP hidden layers + biases in ONE matmul + ONE tanh ----
    h1 = jnp.tanh(jnp.dot(x_ref[...], w1, preferred_element_type=F32))            # (24, 64)

    # ---- layer 2: block-diagonal fused heads -> [x_vec | q*scale | k | v], ONE matmul ----
    z = jnp.dot(h1, w2, preferred_element_type=F32) + b2                           # (24, 128)

    k = z[0:BS, 2 * E:3 * E].reshape(B, S, E)            # (B, S, E)
    v = z[0:BS, 3 * E:4 * E].reshape(B, S, E)            # (B, S, E)
    x_vec = z[BS:BS + B, 0:E]                            # (B, E)  (bhv folded into bc)
    q = z[BS:BS + B, E:2 * E]                            # (B, E)  (already 1/sqrt(hd) scaled)

    # ---- multi-head attention scores + softmax (head segments via precomputed mask) ----
    qm = q[:, None, :] * seg[None, :, :]                                           # (B, H, E)
    scores = jnp.einsum('bhe,bse->bhs', qm, k, preferred_element_type=F32)         # (B, H, S)
    scores = scores - jnp.max(scores, axis=-1, keepdims=True)
    ex = jnp.exp(scores)
    w = ex / jnp.sum(ex, axis=-1, keepdims=True)                                   # (B, H, S)

    # ---- attention output without the (B,H,E) intermediate:
    #      broadcast each head's weights across its hd lanes, multiply V, reduce over S ----
    w_rows = [w[:, h, :] for h in range(H)]                                        # H x (B, S)
    w_exp = jnp.concatenate(
        [jnp.broadcast_to(wr[:, :, None], (B, S, hd)) for wr in w_rows], axis=-1)  # (B, S, E)
    o = jnp.sum(w_exp * v, axis=1)                                                 # (B, E)

    # ---- com_mlp (MHA out-projection folded into the attn half of the hidden weight) ----
    xcat = jnp.concatenate([x_vec, o], axis=-1)                                    # (B, 2E)
    hc = jnp.tanh(jnp.dot(xcat, wc, preferred_element_type=F32) + bc)              # (B, HID)
    out_vals = jnp.dot(hc, wout, preferred_element_type=F32) + bout                # (B, 4)

    # ---- single lane-packed store: [out1 | out2 | attn(h0, s0..S-1) | attn(h1, ...) | ...] ----
    out_ref[...] = jnp.concatenate([out_vals] + w_rows, axis=-1)                   # (B, 4 + H*S)


# ------------------------------------- wrapper ------------------------------------------
def _build_x_all(x_vector, x_buffer):
    """Row-concatenate [x_buffer_flat ; x_vector], pad to (24, 8), add the bias ones column."""
    B, S, _ = x_buffer.shape
    xb = x_buffer.reshape(B * S, REL_IN)
    x_all = jnp.zeros((ROWS_PAD, IN_COLS), F32)
    x_all = x_all.at[:B * S, :REL_IN].set(xb)
    x_all = x_all.at[B * S:B * S + B, :VEC_IN].set(x_vector)
    x_all = x_all.at[:B * S + B, ONES_COL].set(1.0)
    return x_all


@jax.jit
def attention_network_forward(x_vector, x_buffer, packed_params):
    B = x_vector.shape[0]
    S = x_buffer.shape[1]
    x_all = _build_x_all(x_vector, x_buffer)

    vmem = pl.BlockSpec(memory_space=pltpu.MemorySpace.VMEM)
    fused = pl.pallas_call(
        attention_net_kernel,
        out_shape=jax.ShapeDtypeStruct((B, OUT_TOTAL + HEADS * S), F32),
        in_specs=[vmem, vmem],
        out_specs=vmem,
    )(x_all, packed_params)

    out1 = fused[:, :OUT_SIZES[0]]
    out2 = fused[:, OUT_SIZES[0]:OUT_TOTAL]
    attn = fused[:, OUT_TOTAL:].reshape(B, HEADS, S)
    return [out1, out2], attn


# -------------------- one-time parameter folding / packing (wrapper side) ----------------
def pack_params(p):
    """Fold linear-linear chains and pack all weights/biases into one (200, 128) f32 slab."""
    hp = jax.lax.Precision.HIGHEST
    dot = lambda a, b: jnp.dot(a, b, precision=hp)
    scale = 1.0 / math.sqrt(HEAD_DIM)
    E = EMB

    # layer-1 fused weights, biases as an extra row picked up by the ones column
    w1 = jnp.zeros((IN_COLS, 2 * HID), F32)
    w1 = w1.at[:VEC_IN, :HID].set(p["w1v"])
    w1 = w1.at[:REL_IN, HID:2 * HID].set(p["w1r"])
    w1 = w1.at[ONES_COL, :HID].set(p["b1v"][0])
    w1 = w1.at[ONES_COL, HID:2 * HID].set(p["b1r"][0])

    # layer-2 block-diagonal fused heads
    wvq = jnp.concatenate([p["whv"], dot(p["whv"], p["wq"]) * scale], axis=1)      # (HID, 2E)
    wkv = jnp.concatenate([dot(p["whr"], p["wk"]), dot(p["whr"], p["wv"])], axis=1)  # (HID, 2E)
    w2 = jnp.zeros((2 * HID, 4 * E), F32)
    w2 = w2.at[:HID, :2 * E].set(wvq)
    w2 = w2.at[HID:, 2 * E:].set(wkv)
    b2 = jnp.concatenate([
        jnp.zeros((1, E), F32),                               # x_vec bias folded into bc
        (dot(p["bhv"], p["wq"]) + p["bq"]) * scale,
        dot(p["bhr"], p["wk"]) + p["bk"],
        dot(p["bhr"], p["wv"]) + p["bv"],
    ], axis=1)                                                                      # (1, 4E)

    # com hidden with MHA out-projection folded into the x_attn half; bias folds bhv and bo
    wcv = p["wc"][:E, :]
    wca = p["wc"][E:, :]
    wc_packed = jnp.concatenate([wcv, dot(p["wo"], wca)], axis=0)                   # (2E, HID)
    bc_packed = p["bc"] + dot(p["bo"], wca) + dot(p["bhv"], wcv)                    # (1, HID)

    wout = jnp.concatenate([p["wo1"], p["wo2"]], axis=1)                            # (HID, 4)
    bout = jnp.concatenate([p["bo1"], p["bo2"]], axis=1)                            # (1, 4)

    # precomputed head-segment mask
    seg = (np.arange(E)[None, :] // HEAD_DIM == np.arange(HEADS)[:, None]).astype(np.float32)
    seg = jnp.asarray(seg)                                                          # (H, E)

    slab = jnp.zeros((SLAB_ROWS, SLAB_W), F32)

    def put(s, r, a):
        rows, cols = a.shape
        return s.at[r:r + rows, :cols].set(a.astype(F32))

    slab = put(slab, R_SEG, seg)
    slab = put(slab, R_W1, w1)
    slab = put(slab, R_W2, w2)
    slab = put(slab, R_B2, b2)
    slab = put(slab, R_WC, wc_packed)
    slab = put(slab, R_BC, bc_packed)
    slab = put(slab, R_WOUT, wout)
    slab = put(slab, R_BOUT, bout)
    return slab


# ------------------- deterministic synthetic parameters (PyTorch-style) ------------------
def _linear(key, fan_in, fan_out):
    """nn.Linear-style init ([out,in] uniform), returned as [in,out] + [1,out]."""
    kw, kb = jax.random.split(key)
    bound = 1.0 / math.sqrt(fan_in)
    w = jax.random.uniform(kw, (fan_out, fan_in), F32, -bound, bound)
    b = jax.random.uniform(kb, (fan_out,), F32, -bound, bound)
    return w.T, b.reshape(1, fan_out)


def make_params(key):
    keys = jax.random.split(key, 12)
    p = {}
    p["w1v"], p["b1v"] = _linear(keys[0], VEC_IN, HID)      # vec_mlp hidden
    p["whv"], p["bhv"] = _linear(keys[1], HID, EMB)         # vec_mlp head -> emb
    p["w1r"], p["b1r"] = _linear(keys[2], REL_IN, HID)      # rel_mlp hidden
    p["whr"], p["bhr"] = _linear(keys[3], HID, EMB)         # rel_mlp head -> emb
    p["wq"], p["bq"] = _linear(keys[4], EMB, EMB)           # MHA in-proj Q
    p["wk"], p["bk"] = _linear(keys[5], EMB, EMB)           # MHA in-proj K
    p["wv"], p["bv"] = _linear(keys[6], EMB, EMB)           # MHA in-proj V
    p["wo"], p["bo"] = _linear(keys[7], EMB, EMB)           # MHA out-proj
    p["wc"], p["bc"] = _linear(keys[8], 2 * EMB, HID)       # com_mlp hidden
    p["wo1"], p["bo1"] = _linear(keys[9], HID, OUT_SIZES[0])
    p["wo2"], p["bo2"] = _linear(keys[10], HID, OUT_SIZES[1])
    return p


# ------------------------------- pure-JAX reference --------------------------------------
def reference_forward(x_vector, x_buffer, p):
    hv = jnp.tanh(x_vector @ p["w1v"] + p["b1v"])
    xvec = hv @ p["whv"] + p["bhv"]                                 # (B, E)
    hb = jnp.tanh(x_buffer @ p["w1r"] + p["b1r"])
    xbuf = hb @ p["whr"] + p["bhr"]                                 # (B, S, E)

    B, S, E = xbuf.shape
    H, hd = HEADS, EMB // HEADS
    q = (xvec @ p["wq"] + p["bq"]).reshape(B, 1, H, hd)
    k = (xbuf @ p["wk"] + p["bk"]).reshape(B, S, H, hd)
    v = (xbuf @ p["wv"] + p["bv"]).reshape(B, S, H, hd)
    scores = jnp.einsum('bqhd,bkhd->bhqk', q, k) / math.sqrt(hd)    # (B,H,1,S)
    w = jax.nn.softmax(scores, axis=-1)
    o = jnp.einsum('bhqk,bkhd->bqhd', w, v).reshape(B, E)
    x_attn = o @ p["wo"] + p["bo"]

    x_com = jnp.concatenate([xvec, x_attn], axis=-1)
    hc = jnp.tanh(x_com @ p["wc"] + p["bc"])
    out1 = hc @ p["wo1"] + p["bo1"]
    out2 = hc @ p["wo2"] + p["bo2"]
    return [out1, out2], w[:, :, 0, :]                              # attention squeezed -> (B,H,S)


# ---------------------------------------- main --------------------------------------------
if __name__ == "__main__":
    key = jax.random.PRNGKey(0)
    k_params, k_vec, k_buf = jax.random.split(key, 3)

    params = make_params(k_params)
    packed = pack_params(params)     # folded + packed ONCE, outside the forward call
    x_vector = jax.random.normal(k_vec, (BATCH, VEC_IN), dtype=F32)
    x_buffer = jax.random.normal(k_buf, (BATCH, SEQ, REL_IN), dtype=F32)

    (out1, out2), attn = attention_network_forward(x_vector, x_buffer, packed)
    jax.block_until_ready((out1, out2, attn))

    (r1, r2), rattn = reference_forward(x_vector, x_buffer, params)
    # Linear-layer folding (vec/rel heads into QKV, out-proj into com hidden, bias moves)
    # reorders float accumulation -> modest tolerance.
    np.testing.assert_allclose(np.asarray(out1), np.asarray(r1), rtol=1e-4, atol=1e-4)
    np.testing.assert_allclose(np.asarray(out2), np.asarray(r2), rtol=1e-4, atol=1e-4)
    np.testing.assert_allclose(np.asarray(attn), np.asarray(rattn), rtol=1e-4, atol=1e-4)

    print("KERNEL_OK")
</pallas_src>

<mosaic_0001>
module attributes {stable_mosaic.version = 11 : i64} {
  func.func @attention_net_kernel(%arg0: memref<24x8xf32, #tpu.memory_space<vmem>>, %arg1: memref<200x128xf32, #tpu.memory_space<vmem>>, %arg2: memref<2x36xf32, #tpu.memory_space<vmem>>) attributes {dimension_semantics = [], scalar_prefetch = 0 : i64, scratch_operands = 0 : i64, tpu.core_type = #tpu.core_type<tc>} {
    %c0 = arith.constant 0 : index
    %c0_0 = arith.constant 0 : index
    %0 = vector.load %arg1[%c0, %c0_0] : memref<200x128xf32, #tpu.memory_space<vmem>>, vector<4x32xf32>
    %c8 = arith.constant 8 : index
    %c0_1 = arith.constant 0 : index
    %1 = vector.load %arg1[%c8, %c0_1] : memref<200x128xf32, #tpu.memory_space<vmem>>, vector<8x64xf32>
    %c16 = arith.constant 16 : index
    %c0_2 = arith.constant 0 : index
    %2 = vector.load %arg1[%c16, %c0_2] : memref<200x128xf32, #tpu.memory_space<vmem>>, vector<64x128xf32>
    %c80 = arith.constant 80 : index
    %c0_3 = arith.constant 0 : index
    %3 = vector.load %arg1[%c80, %c0_3] : memref<200x128xf32, #tpu.memory_space<vmem>>, vector<1x128xf32>
    %c88 = arith.constant 88 : index
    %c0_4 = arith.constant 0 : index
    %4 = vector.load %arg1[%c88, %c0_4] : memref<200x128xf32, #tpu.memory_space<vmem>>, vector<64x32xf32>
    %c152 = arith.constant 152 : index
    %c0_5 = arith.constant 0 : index
    %5 = vector.load %arg1[%c152, %c0_5] : memref<200x128xf32, #tpu.memory_space<vmem>>, vector<1x32xf32>
    %c160 = arith.constant 160 : index
    %c0_6 = arith.constant 0 : index
    %6 = vector.load %arg1[%c160, %c0_6] : memref<200x128xf32, #tpu.memory_space<vmem>>, vector<32x4xf32>
    %c192 = arith.constant 192 : index
    %c0_7 = arith.constant 0 : index
    %7 = vector.load %arg1[%c192, %c0_7] : memref<200x128xf32, #tpu.memory_space<vmem>>, vector<1x4xf32>
    %c0_8 = arith.constant 0 : index
    %c0_9 = arith.constant 0 : index
    %8 = vector.load %arg0[%c0_8, %c0_9] : memref<24x8xf32, #tpu.memory_space<vmem>>, vector<24x8xf32>
    %cst = arith.constant dense<0.000000e+00> : vector<24x64xf32>
    %9 = tpu.matmul %8, %1, %cst {dimension_numbers = #tpu.dot_dimension_numbers<[1], [0], [0], [1], [0, 0, 1, 1], [], []>} : vector<24x8xf32>, vector<8x64xf32>, vector<24x64xf32> -> vector<24x64xf32>
    %10 = math.tanh %9 : vector<24x64xf32>
    %cst_10 = arith.constant dense<0.000000e+00> : vector<24x128xf32>
    %11 = tpu.matmul %10, %2, %cst_10 {dimension_numbers = #tpu.dot_dimension_numbers<[1], [0], [0], [1], [0, 0, 1, 1], [], []>} : vector<24x64xf32>, vector<64x128xf32>, vector<24x128xf32> -> vector<24x128xf32>
    %12 = vector.broadcast %3 : vector<1x128xf32> to vector<24x128xf32>
    %13 = arith.addf %11, %12 : vector<24x128xf32>
    %14 = vector.extract_strided_slice %13 {offsets = [0, 64], sizes = [16, 32], strides = [1, 1]} : vector<24x128xf32> to vector<16x32xf32>
    %15 = vector.shape_cast %14 : vector<16x32xf32> to vector<2x8x32xf32>
    %16 = vector.extract_strided_slice %13 {offsets = [0, 96], sizes = [16, 32], strides = [1, 1]} : vector<24x128xf32> to vector<16x32xf32>
    %17 = vector.shape_cast %16 : vector<16x32xf32> to vector<2x8x32xf32>
    %18 = vector.extract_strided_slice %13 {offsets = [16, 0], sizes = [2, 32], strides = [1, 1]} : vector<24x128xf32> to vector<2x32xf32>
    %19 = vector.extract_strided_slice %13 {offsets = [16, 32], sizes = [2, 32], strides = [1, 1]} : vector<24x128xf32> to vector<2x32xf32>
    %20 = vector.shape_cast %19 : vector<2x32xf32> to vector<2x1x32xf32>
    %21 = vector.shape_cast %0 : vector<4x32xf32> to vector<1x4x32xf32>
    %22 = vector.broadcast %20 : vector<2x1x32xf32> to vector<2x4x32xf32>
    %23 = vector.broadcast %21 : vector<1x4x32xf32> to vector<2x4x32xf32>
    %24 = arith.mulf %22, %23 : vector<2x4x32xf32>
    "tpu.trace_start"() <{level = 10 : i32, message = "bhe,bse->bhs"}> : () -> ()
    %cst_11 = arith.constant dense<0.000000e+00> : vector<2x4x8xf32>
    %25 = tpu.matmul %24, %15, %cst_11 {dimension_numbers = #tpu.dot_dimension_numbers<[2], [2], [1], [1], [0, 0, 0, 1, 1, 1], [0], [0]>} : vector<2x4x32xf32>, vector<2x8x32xf32>, vector<2x4x8xf32> -> vector<2x4x8xf32>
    "tpu.trace_stop"() : () -> ()
    %cst_12 = arith.constant dense<0xFF800000> : vector<2x4xf32>
    %26 = vector.multi_reduction <maximumf>, %25, %cst_12 [2] : vector<2x4x8xf32> to vector<2x4xf32>
    %27 = vector.shape_cast %26 : vector<2x4xf32> to vector<2x4x1xf32>
    %28 = vector.broadcast %27 : vector<2x4x1xf32> to vector<2x4x8xf32>
    %29 = arith.subf %25, %28 : vector<2x4x8xf32>
    %30 = math.exp %29 : vector<2x4x8xf32>
    %cst_13 = arith.constant dense<0.000000e+00> : vector<2x4xf32>
    %31 = vector.multi_reduction <add>, %30, %cst_13 [2] : vector<2x4x8xf32> to vector<2x4xf32>
    %32 = vector.shape_cast %31 : vector<2x4xf32> to vector<2x4x1xf32>
    %33 = vector.broadcast %32 : vector<2x4x1xf32> to vector<2x4x8xf32>
    %34 = arith.divf %30, %33 : vector<2x4x8xf32>
    %35 = vector.extract_strided_slice %34 {offsets = [0, 0, 0], sizes = [2, 1, 8], strides = [1, 1, 1]} : vector<2x4x8xf32> to vector<2x1x8xf32>
    %36 = vector.shape_cast %35 : vector<2x1x8xf32> to vector<2x8xf32>
    %37 = vector.extract_strided_slice %34 {offsets = [0, 1, 0], sizes = [2, 1, 8], strides = [1, 1, 1]} : vector<2x4x8xf32> to vector<2x1x8xf32>
    %38 = vector.shape_cast %37 : vector<2x1x8xf32> to vector<2x8xf32>
    %39 = vector.extract_strided_slice %34 {offsets = [0, 2, 0], sizes = [2, 1, 8], strides = [1, 1, 1]} : vector<2x4x8xf32> to vector<2x1x8xf32>
    %40 = vector.shape_cast %39 : vector<2x1x8xf32> to vector<2x8xf32>
    %41 = vector.extract_strided_slice %34 {offsets = [0, 3, 0], sizes = [2, 1, 8], strides = [1, 1, 1]} : vector<2x4x8xf32> to vector<2x1x8xf32>
    %42 = vector.shape_cast %41 : vector<2x1x8xf32> to vector<2x8xf32>
    %43 = vector.shape_cast %36 : vector<2x8xf32> to vector<2x8x1xf32>
    %44 = vector.shape_cast %43 : vector<2x8x1xf32> to vector<2x8x1xf32>
    %45 = vector.broadcast %44 : vector<2x8x1xf32> to vector<2x8x8xf32>
    %46 = vector.shape_cast %38 : vector<2x8xf32> to vector<2x8x1xf32>
    %47 = vector.shape_cast %46 : vector<2x8x1xf32> to vector<2x8x1xf32>
    %48 = vector.broadcast %47 : vector<2x8x1xf32> to vector<2x8x8xf32>
    %49 = vector.shape_cast %40 : vector<2x8xf32> to vector<2x8x1xf32>
    %50 = vector.shape_cast %49 : vector<2x8x1xf32> to vector<2x8x1xf32>
    %51 = vector.broadcast %50 : vector<2x8x1xf32> to vector<2x8x8xf32>
    %52 = vector.shape_cast %42 : vector<2x8xf32> to vector<2x8x1xf32>
    %53 = vector.shape_cast %52 : vector<2x8x1xf32> to vector<2x8x1xf32>
    %54 = vector.broadcast %53 : vector<2x8x1xf32> to vector<2x8x8xf32>
    %55 = tpu.concatenate %45, %48, %51, %54 in 2 : vector<2x8x8xf32>, vector<2x8x8xf32>, vector<2x8x8xf32>, vector<2x8x8xf32> -> vector<2x8x32xf32>
    %56 = arith.mulf %55, %17 : vector<2x8x32xf32>
    %cst_14 = arith.constant dense<0.000000e+00> : vector<2x32xf32>
    %57 = vector.multi_reduction <add>, %56, %cst_14 [1] : vector<2x8x32xf32> to vector<2x32xf32>
    %58 = tpu.concatenate %18, %57 in 1 : vector<2x32xf32>, vector<2x32xf32> -> vector<2x64xf32>
    %cst_15 = arith.constant dense<0.000000e+00> : vector<2x32xf32>
    %59 = tpu.matmul %58, %4, %cst_15 {dimension_numbers = #tpu.dot_dimension_numbers<[1], [0], [0], [1], [0, 0, 1, 1], [], []>} : vector<2x64xf32>, vector<64x32xf32>, vector<2x32xf32> -> vector<2x32xf32>
    %60 = vector.broadcast %5 : vector<1x32xf32> to vector<2x32xf32>
    %61 = arith.addf %59, %60 : vector<2x32xf32>
    %62 = math.tanh %61 : vector<2x32xf32>
    %cst_16 = arith.constant dense<0.000000e+00> : vector<2x4xf32>
    %63 = tpu.matmul %62, %6, %cst_16 {dimension_numbers = #tpu.dot_dimension_numbers<[1], [0], [0], [1], [0, 0, 1, 1], [], []>} : vector<2x32xf32>, vector<32x4xf32>, vector<2x4xf32> -> vector<2x4xf32>
    %64 = vector.broadcast %7 : vector<1x4xf32> to vector<2x4xf32>
    %65 = arith.addf %63, %64 : vector<2x4xf32>
    %66 = tpu.concatenate %65, %36, %38, %40, %42 in 1 : vector<2x4xf32>, vector<2x8xf32>, vector<2x8xf32>, vector<2x8xf32>, vector<2x8xf32> -> vector<2x36xf32>
    %c0_17 = arith.constant 0 : index
    %c0_18 = arith.constant 0 : index
    %67 = vector.load %arg2[%c0_17, %c0_18] : memref<2x36xf32, #tpu.memory_space<vmem>>, vector<2x36xf32>
    tpu.vector_store %arg2[%c0_17, %c0_18], %66 {strides = array<i32>} : memref<2x36xf32, #tpu.memory_space<vmem>>, vector<2x36xf32>,
    return
  }
}

</mosaic_0001>

<bundles_post_ra>
// kernel: attention_network_forward.1
= control target key start
LH: loop header
LB: loop body
LE: loop exit
PB: predicated region body
PF: predicated region fallthrough
CT: control target
= control target key end

     0   :  { %7 = vsyncpa [#allocation3], 0  ;;  %s926_s9 = smov [#allocation2]   ;;  %s1073_s0 = inlined_call_operand.vmem [shape: f32[24,8], index: 0, kind: input, shape index: {}]   ;;  %s1074_s1 = inlined_call_operand.hbm [shape: f32[200,128], index: 1, kind: input, shape index: {}]   ;;  %s1075_s2 = inlined_call_operand.vmem [shape: f32[2,36], index: 2, kind: output, shape index: {}]  }
   0x1   :  { %s15_s10 = sshll.u32 %s926_s9, 4  ;;  %s16_s10 = int_to_ptr.vmem [resolvable:$true] %s15_s10 }
   0x2   :  { %s912_s11 = scalar_lea.vmem %s16_s10, 3200  ;;  %p917_p1 = scmp.lt.s32.totalorder %s16_s10, %s16_s10 }
   0x3   :  { %p913_p0 = scmp.ne.s32.totalorder %s16_s10, %s912_s11  ;;  %p918_p2 = scmp.lt.s32.totalorder %s912_s11, %s912_s11 }
   0x5   :  { %p919_p3 = por %p918_p2, %p917_p1 }
   0x7   :  { %p920_p4 = pnand %p919_p3, %p913_p0 }
   0x9   :  { %923 = shalt.err (!%p920_p4)
}
   0xa   :  { %s927_s12 = smov 128   ;;  %s928_s13 = smov 8  }
   0xb   :  { %21 = dma.hbm_to_vmem [thread:$0]  %s1074_s1, 3200, %s16_s10, [#allocation3], %s927_s12, %s927_s12, %s928_s13  }
   0xc   :  { %924 = dma.done.wait [#allocation3], 3200  }
   0xd   :  { %925 = vsyncadd [#allocation3], 4294964096  ;;  %v929_v0 = vmov 0.0   ;;  %vm930_vm0 = vmmov 0   ;;  %vm53_vm1 = vcmask 64512   ;;  %v26_v1 = vld [vmem:[#allocation2 + $0x8] sm:$0xff]  ;;  %v244_v26 = vlaneseq }
   0xe   :  { %799 = vmatprep.subr.mxu0 %v929_v0  ;;  %801 = vmatprep.mubr.msk.f32.mxu0 %vm930_vm0, %v929_v0  ;;  %v50_v2 = vld [vmem:[%s1073_s0] sm:$0xff]  ;;  %v51_v3 = vld [vmem:[%s1073_s0 + $0x8] sm:$0xff]  ;;  %v52_v4 = vld [vmem:[%s1073_s0 + $0x10] sm:$0xff]  ;;  %s931_s0 = smov 32   ;;  %vm150_vm2 = vcmask 523264   ;;  %s933_s21 = smov 64  }
   0xf   :  { %810 = vmatprep.subr.mxu1 %v929_v0  ;;  %826 = vmatprep.mubr.msk.f32.mxu1 %vm930_vm0, %v929_v0  ;;  %v34_v5 = vld [vmem:[#allocation2 + $0x48] sm:$0xff]  ;;  %v33_v6 = vld [vmem:[#allocation2 + $0x40] sm:$0xff]  ;;  %v32_v7 = vld [vmem:[#allocation2 + $0x38] sm:$0xff]  ;;  %v932_v24 = vmov 1966171168   ;;  %v1003_v31 = vshrl.u32 %v244_v26, 7 }
  0x10   :  { %800 = vmatpush3.msra.mxu0 %v26_v1  ;;  %811 = vmatpush3.msra.mxu1 %v34_v5  ;;  %v31_v8 = vld [vmem:[#allocation2 + $0x30] sm:$0xff]  ;;  %v30_v9 = vld [vmem:[#allocation2 + $0x28] sm:$0xff]  ;;  %v29_v10 = vld [vmem:[#allocation2 + $0x20] sm:$0xff]  ;;  %v242_v25 = vunpack.c.l.s4 %v932_v24  ;;  %s934_s22 = smov 96   ;;  %vm285_vm3 = vcmask 261120   ;;  %vm440_vm4 = vcmask 60416  }
  0x11   :  { %802 = vmatmul.mubr.msk.f32.vlgmr.msra.gmra.mxu0 %vm53_vm1, %v50_v2  ;;  %835 = vmatprep.subr.mxu0 %v929_v0  ;;  %v28_v11 = vld [vmem:[#allocation2 + $0x18] sm:$0xff]  ;;  %v27_v12 = vld [vmem:[#allocation2 + $0x10] sm:$0xff]  ;;  %v25_v13 = vld [vmem:[#allocation2] sm:$0xf]  ;;  %v1010_v39 = vsub.s32 0, %v1003_v31  ;;  %vm551_vm5 = vcmask 1041409  }
  0x12   :  { %804 = vmatprep.mubr.msk.f32.mxu0 %vm930_vm0, %v929_v0  ;;  %812 = vmatprep.subr.mxu1 %v929_v0  ;;  %v754_v23 = vld [vmem:[#allocation2 + $0x50] ss:$0 sm:$0xff]  ;;  %v243_v30 = vunpack.c.0.s8 %v242_v25  ;;  %s935_s23 = smov 4   ;;  %s936_s24 = smov 20   ;;  %vm521_vm6 = vcmask 130048   ;;  %vm524_vm7 = vcmask 195584  }
  0x13   :  { %813 = vmatpush3.msra.mxu1 %v33_v6  ;;  %274 = vrot.lane.b32.xlu0 %v25_v13, %s931_s0  ;;  %v493_v13 = vsub.s32 2, %v1003_v31  ;;  %s937_s25 = smov 12   ;;  %s938_s26 = smov 28   ;;  %vm736_vm8 = vcmask 31744   ;;  %vm738_vm9 = vcmask 97280   ;;  %vm740_vm10 = vcmask 162816  }
  0x14   :  { %814 = vmatprep.subr.mxu1 %v929_v0  ;;  %v246_v34 = vsub.s32 %v243_v30, %v1003_v31  ;;  %vm742_vm11 = vcmask 228352   ;;  %vm744_vm12 = vcmask 287744  }
  0x15   :  { %805 = vmatmul.mubr.msk.f32.gmra.mxu0 %vm53_vm1, %v51_v3  ;;  %815 = vmatpush3.msra.mxu1 %v32_v7 }
  0x16   :  { %807 = vmatprep.mubr.msk.f32.mxu0 %vm930_vm0, %v929_v0  ;;  %816 = vmatprep.subr.mxu1 %v929_v0 }
  0x17   :  { %817 = vmatpush3.msra.mxu1 %v31_v8  ;;  %v479_v8 = vsub.s32 1, %v1003_v31 }
  0x18   :  { %818 = vmatprep.subr.mxu1 %v929_v0 }
  0x19   :  { %808 = vmatmul.mubr.msk.f32.gmra.mxu0 %vm53_vm1, %v52_v4  ;;  %819 = vmatpush3.msra.mxu1 %v30_v9 }
  0x1a   :  { %837 = vmatprep.mubr.msk.f32.mxu0 %vm930_vm0, %v929_v0  ;;  %820 = vmatprep.subr.mxu1 %v929_v0 }
  0x1b   :  { %821 = vmatpush3.msra.mxu1 %v29_v10 }
  0x1c   :  { %822 = vmatprep.subr.mxu1 %v929_v0 }
  0x1d   :  { %823 = vmatpush3.msra.mxu1 %v28_v11 }
  0x1e   :  { %824 = vmatprep.subr.mxu1 %v929_v0 }
  0x1f   :  { %825 = vmatpush3.msra.mxu1 %v27_v12 }
  0x20   :  { %845 = vmatprep.subr.mxu1 %v929_v0 }
  0x85   :  { %v275_v42 = vpop.permute.xlu0 %274 }
  0xd1   :  { %v129_v14 = vpop.f32.mrf.mxu0 }
  0xd2   :  { %888 = vtanh.f32 %v129_v14 }
  0xd3   :  { %v803_v15 = vpop.f32.mrf.mxu0 }
  0xd5   :  { %v134_v16 = vpop.f32.mrf.mxu0 }
  0xd6   :  { %890 = vtanh.f32 %v134_v16  ;;  %v507_v16 = vsub.s32 3, %v1003_v31 }
  0xd7   :  { %v806_v17 = vpop.f32.mrf.mxu0 }
  0xd9   :  { %v139_v18 = vpop.f32.mrf.mxu0 }
  0xda   :  { %892 = vtanh.f32 %v139_v18 }
  0xdb   :  { %v809_v19 = vpop.f32.mrf.mxu0 }
  0xdf   :  { %v889_v20 = vpop.eup %888 }
  0xe0   :  { %827 = vmatmul.mubr.msk.f32.vlgmr.msra.gmra.mxu1 %vm150_vm2, %v889_v20 }
  0xe1   :  { %829 = vmatprep.mubr.msk.f32.mxu1 %vm930_vm0, %v929_v0 }
  0xe3   :  { %v891_v21 = vpop.eup %890 }
  0xe4   :  { %830 = vmatmul.mubr.msk.f32.gmra.mxu1 %vm150_vm2, %v891_v21 }
  0xe5   :  { %832 = vmatprep.mubr.msk.f32.mxu1 %vm930_vm0, %v929_v0 }
  0xe7   :  { %v893_v22 = vpop.eup %892 }
  0xe8   :  { %833 = vmatmul.mubr.msk.f32.gmra.mxu1 %vm150_vm2, %v893_v22 }
  0xe9   :  { %861 = vmatprep.mubr.msk.f32.mxu1 %vm930_vm0, %v929_v0 }
 0x1a0   :  { %v226_v27 = vpop.f32.mrf.mxu1 }
 0x1a1   :  { %v1000_v28 = vadd.f32 %v754_v23, %v226_v27 }
 0x1a2   :  { %v828_v29 = vpop.f32.mrf.mxu1 }
 0x1a3   :  { %283 = vrot.lane.b32.xlu0 %v1000_v28, %s933_s21 }
 0x1a4   :  { %v231_v32 = vpop.f32.mrf.mxu1 }
 0x1a5   :  { %v1014_v48 = vadd.f32 %v754_v23, %v231_v32 }
 0x1a6   :  { %v831_v33 = vpop.f32.mrf.mxu1 }
 0x1a8   :  { %v236_v35 = vpop.f32.mrf.mxu1 }
 0x1a9   :  { %v1006_v36 = vadd.f32 %v754_v23, %v236_v35  ;;  %v42_v35 = vld [vmem:[#allocation2 + $0x88] sm:$0xff] }
 0x1aa   :  { %v834_v37 = vpop.f32.mrf.mxu1 }
 0x1ab   :  { %v247_v38 = vrot.slane %v1006_v36, %v246_v34  ;;  %v40_v37 = vld [vmem:[#allocation2 + $0x78] sm:$0xff] }
 0x1ad   :  { %v248_v40 = vcombine.high %v247_v38, %v247_v38  ;;  %v255_v41 = vrot.slane %v247_v38, %v246_v34  ;;  %v39_v38 = vld [vmem:[#allocation2 + $0x70] sm:$0xff] }
 0x1af   :  { %v262_v43 = vrot.slane %v248_v40, %v246_v34  ;;  %v266_v44 = vrot.slane %v255_v41, %v1010_v39  ;;  %v43_v34 = vld [vmem:[#allocation2 + $0x90] sm:$0xff]  ;;  %v37_v40 = vld [vmem:[#allocation2 + $0x60] sm:$0xff] }
 0x1b0   :  { %846 = vmatpush3.msra.mxu1 %v43_v34 }
 0x1b1   :  { %v270_v45 = vrot.slane %v262_v43, %v1010_v39  ;;  %v277_v46 = vmul.f32 %v275_v42, %v266_v44  ;;  %847 = vmatprep.subr.mxu1 %v929_v0 }
 0x1b2   :  { %848 = vmatpush3.msra.mxu1 %v42_v35 }
 0x1b3   :  { %v278_v47 = vmul.f32 %v275_v42, %v270_v45  ;;  %280 = vrot.lane.b32.xlu1 %v277_v46, %s934_s22  ;;  %849 = vmatprep.subr.mxu1 %v929_v0 }
 0x1b5   :  { %361 = vrot.lane.b32.xlu0 %v278_v47, %s934_s22 }
 0x1b7   :  { %364 = vrot.lane.b32.xlu1 %v1014_v48, %s933_s21 }
 0x215   :  { %v284_v49 = vpop.permute.xlu0 %283 }
 0x216   :  { %836 = vmatpush3.xpose.msk.msra.mxu0 %vm285_vm3, %v284_v49 }
 0x217   :  { %840 = vmatprep.subr.mxu0 %v929_v0 }
 0x225   :  { %v281_v50 = vpop.permute.xlu1 %280 }
 0x226   :  { %838 = vmatmul.mubr.msk.f32.vlgmr.msra.gmra.mxu0 %vm285_vm3, %v281_v50 }
 0x227   :  { %842 = vmatprep.mubr.msk.f32.mxu0 %vm930_vm0, %v929_v0  ;;  %v362_v52 = vpop.permute.xlu0 %361 }
 0x229   :  { %v365_v51 = vpop.permute.xlu1 %364 }
 0x22a   :  { %841 = vmatpush3.xpose.msk.msra.mxu0 %vm285_vm3, %v365_v51 }
 0x22b   :  { %864 = vmatprep.subr.mxu0 %v929_v0 }
 0x22d   :  { %843 = vmatmul.mubr.msk.f32.vlgmr.msra.gmra.mxu0 %vm285_vm3, %v362_v52 }
 0x22e   :  { %872 = vmatprep.mubr.msk.f32.mxu0 %vm930_vm0, %v929_v0 }
 0x2e6   :  { %v356_v53 = vpop.f32.mrf.mxu0 }
 0x2e7   :  { %v441_v54 = vsel %vm440_vm4, %v356_v53, -inf }
 0x2e8   :  { %442 = vmax.xlane.f32.xlu1 %v441_v54  ;;  %v839_v55 = vpop.f32.mrf.mxu0 }
 0x2ed   :  { %v436_v56 = vpop.f32.mrf.mxu0 }
 0x2ee   :  { %v444_v57 = vsel %vm440_vm4, %v436_v56, -inf }
 0x2ef   :  { %445 = vmax.xlane.f32.xlu0 %v444_v57  ;;  %v844_v58 = vpop.f32.mrf.mxu0 }
 0x371   :  { %v443_v59 = vpop.xlane.xlu1 %442 }
 0x372   :  { %v447_v60 = vsub.f32 %v356_v53, %v443_v59 }
 0x374   :  { %v449_v61 = vmul.f32 1.442695, %v447_v60 }
 0x376   :  { %894 = vpow2.f32 %v449_v61 }
 0x378   :  { %v446_v62 = vpop.xlane.xlu0 %445 }
 0x379   :  { %v448_v63 = vsub.f32 %v436_v56, %v446_v62 }
 0x37b   :  { %v451_v1 = vmul.f32 1.442695, %v448_v63 }
 0x37d   :  { %896 = vpow2.f32 %v451_v1  ;;  %v36_v1 = vld [vmem:[#allocation2 + $0x58] sm:$0xff] }
 0x383   :  { %v895_v2 = vpop.eup %894 }
 0x384   :  { %v453_v3 = vsel %vm440_vm4, %v895_v2, 0.0 }
 0x385   :  { %454 = vadd.xlane.f32.xlu0 %v453_v3 }
 0x38a   :  { %v897_v4 = vpop.eup %896 }
 0x38b   :  { %v456_v5 = vsel %vm440_vm4, %v897_v4, 0.0 }
 0x38c   :  { %457 = vadd.xlane.f32.xlu1 %v456_v5 }
 0x40e   :  { %v455_v6 = vpop.xlane.xlu0 %454 }
 0x40f   :  { %898 = vrcp.f32 %v455_v6 }
 0x415   :  { %v458_v7 = vpop.xlane.xlu1 %457 }
 0x416   :  { %900 = vrcp.f32 %v458_v7 }
 0x41c   :  { %v899_v9 = vpop.eup %898 }
 0x41d   :  { %v460_v10 = vmul.f32 %v899_v9, %v895_v2 }
 0x41f   :  { %v480_v11 = vrot.slane %v460_v10, %v479_v8  ;;  %v466_v12 = vrot.slane %v460_v10, %v1010_v39  ;;  %v494_v15 = vrot.slane %v460_v10, %v493_v13  ;;  %v719_v18 = vrot.slane %v460_v10, 1 }
 0x420   :  { %v508_v20 = vrot.slane %v460_v10, %v507_v16  ;;  %v730_v22 = vrot.slane %v460_v10, 3  ;;  %v724_v32 = vrot.slane %v460_v10, 2 }
 0x421   :  { %482 = vbcast.lane.b32.xlu1 %v480_v11, 256  ;;  %468 = vbcast.lane.b32.xlu0 %v466_v12, 256 }
 0x423   :  { %v901_v14 = vpop.eup %900 }
 0x424   :  { %v462_v17 = vmul.f32 %v901_v14, %v897_v4  ;;  %v48_v14 = vld [vmem:[#allocation2 + $0xb8] sm:$0xff] }
 0x425   :  { %496 = vbcast.lane.b32.xlu1 %v494_v15, 256  ;;  %v47_v15 = vld [vmem:[#allocation2 + $0xb0] sm:$0xff]  ;;  %865 = vmatpush3.msra.mxu0 %v48_v14 }
 0x426   :  { %v487_v19 = vrot.slane %v462_v17, %v479_v8  ;;  %v1036_v21 = vsel %vm551_vm5, %v462_v17, %v719_v18  ;;  %v731_v23 = vrot.slane %v462_v17, 2  ;;  %v501_v25 = vrot.slane %v462_v17, %v493_v13  ;;  %866 = vmatprep.subr.mxu0 %v929_v0  ;;  %v762_v18 = vld [vmem:[#allocation2 + $0x98] ss:$0 sm:$0xff] }
 0x427   :  { %v473_v26 = vrot.slane %v462_v17, %v1010_v39  ;;  %v515_v27 = vrot.slane %v462_v17, %v507_v16  ;;  %v714_v29 = vrot.slane %v462_v17, 7  ;;  %v725_v31 = vrot.slane %v462_v17, 1  ;;  %v38_v39 = vld [vmem:[#allocation2 + $0x68] sm:$0xff]  ;;  %867 = vmatpush3.msra.mxu0 %v47_v15  ;;  %v45_v17 = vld [vmem:[#allocation2 + $0xa0] sm:$0xff] }
 0x428   :  { %489 = vbcast.lane.b32.xlu0 %v487_v19, 256  ;;  %v1039_v24 = vsel %vm551_vm5, %v731_v23, %v730_v22  ;;  %v46_v16 = vld [vmem:[#allocation2 + $0xa8] sm:$0xff]  ;;  %868 = vmatprep.subr.mxu0 %v929_v0  ;;  %v764_v23 = vld [vmem:[#allocation2 + $0xc0] ss:$0 sm:$0xff] }
 0x429   :  { %510 = vbcast.lane.b32.xlu1 %v508_v20, 256  ;;  %v715_v30 = vsel %vm551_vm5, %v714_v29, %v460_v10  ;;  %v726_v33 = vsel %vm551_vm5, %v725_v31, %v724_v32  ;;  %869 = vmatpush3.msra.mxu0 %v46_v16 }
 0x42a   :  { %870 = vmatprep.subr.mxu0 %v929_v0 }
 0x42b   :  { %871 = vmatpush3.msra.mxu0 %v45_v17 }
 0x42c   :  { %503 = vbcast.lane.b32.xlu0 %v501_v25, 256 }
 0x42d   :  { %475 = vbcast.lane.b32.xlu1 %v473_v26, 256 }
 0x430   :  { %517 = vbcast.lane.b32.xlu0 %v515_v27, 256 }
 0x431   :  { %527 = vrot.lane.b32.xlu1 %v1000_v28, %s931_s0  ;;  %v41_v28 = vld [vmem:[#allocation2 + $0x80] sm:$0xff] }
 0x432   :  { %850 = vmatpush3.msra.mxu1 %v41_v28 }
 0x433   :  { %851 = vmatprep.subr.mxu1 %v929_v0 }
 0x434   :  { %529 = vrot.lane.b32.xlu0 %v1014_v48, %s931_s0  ;;  %852 = vmatpush3.msra.mxu1 %v40_v37 }
 0x435   :  { %853 = vmatprep.subr.mxu1 %v929_v0 }
 0x436   :  { %854 = vmatpush3.msra.mxu1 %v39_v38 }
 0x437   :  { %855 = vmatprep.subr.mxu1 %v929_v0 }
 0x438   :  { %716 = vrot.lane.b32.xlu0 %v715_v30, %s935_s23  ;;  %856 = vmatpush3.msra.mxu1 %v38_v39 }
 0x439   :  { %857 = vmatprep.subr.mxu1 %v929_v0 }
 0x43a   :  { %858 = vmatpush3.msra.mxu1 %v37_v40 }
 0x43b   :  { %859 = vmatprep.subr.mxu1 %v929_v0 }
 0x43c   :  { %727 = vrot.lane.b32.xlu0 %v726_v33, %s936_s24  ;;  %860 = vmatpush3.msra.mxu1 %v36_v1 }
 0x493   :  { %v483_v41 = vpop.permute.xlu1 %482  ;;  %v469_v42 = vpop.permute.xlu0 %468 }
 0x494   :  { %v519_v49 = vsel %vm53_vm1, %v469_v42, %v483_v41 }
 0x497   :  { %v497_v43 = vpop.permute.xlu1 %496 }
 0x498   :  { %v522_v50 = vsel %vm521_vm6, %v519_v49, %v497_v43 }
 0x49a   :  { %v490_v44 = vpop.permute.xlu0 %489 }
 0x49b   :  { %v511_v45 = vpop.permute.xlu1 %510 }
 0x49c   :  { %v525_v53 = vsel %vm524_vm7, %v522_v50, %v511_v45 }
 0x49e   :  { %v504_v46 = vpop.permute.xlu0 %503 }
 0x49f   :  { %v476_v47 = vpop.permute.xlu1 %475 }
 0x4a0   :  { %v520_v48 = vsel %vm53_vm1, %v476_v47, %v490_v44 }
 0x4a1   :  { %v523_v54 = vsel %vm521_vm6, %v520_v48, %v504_v46 }
 0x4a2   :  { %v518_v51 = vpop.permute.xlu0 %517 }
 0x4a3   :  { %v528_v52 = vpop.permute.xlu1 %527  ;;  %v526_v57 = vsel %vm524_vm7, %v523_v54, %v518_v51 }
 0x4a4   :  { %v533_v55 = vmul.f32 %v528_v52, %v525_v53 }
 0x4a6   :  { %v535_v56 = vsel %vm285_vm3, %v533_v55, 0.0  ;;  %v530_v58 = vpop.permute.xlu0 %529 }
 0x4a7   :  { %v536_v59 = vrot.slane %v535_v56, 4  ;;  %v534_v60 = vmul.f32 %v530_v58, %v526_v57 }
 0x4a9   :  { %v537_v61 = vadd.f32 %v536_v59, %v535_v56  ;;  %v542_v62 = vsel %vm285_vm3, %v534_v60, 0.0 }
 0x4aa   :  { %v543_v63 = vrot.slane %v542_v62, 4  ;;  %v717_v22 = vpop.permute.xlu0 %716 }
 0x4ab   :  { %v538_v2 = vrot.slane %v537_v61, 2 }
 0x4ac   :  { %v544_v3 = vadd.f32 %v543_v63, %v542_v62 }
 0x4ad   :  { %v539_v4 = vadd.f32 %v538_v2, %v537_v61 }
 0x4ae   :  { %v545_v5 = vrot.slane %v544_v3, 2  ;;  %v728_v0 = vpop.permute.xlu0 %727 }
 0x4af   :  { %v540_v6 = vrot.slane %v539_v4, 1 }
 0x4b0   :  { %v546_v7 = vadd.f32 %v545_v5, %v544_v3 }
 0x4b1   :  { %v541_v9 = vadd.f32 %v540_v6, %v539_v4 }
 0x4b2   :  { %v547_v8 = vrot.slane %v546_v7, 1 }
 0x4b4   :  { %v548_v10 = vadd.f32 %v547_v8, %v546_v7 }
 0x4b6   :  { %v552_v11 = vsel %vm551_vm5, %v548_v10, %v541_v9 }
 0x4b7   :  { %553 = vrot.lane.b32.xlu1 %v552_v11, %s931_s0 }
 0x4bb   :  { %721 = vrot.lane.b32.xlu1 %v1036_v21, %s937_s25 }
 0x4bf   :  { %733 = vrot.lane.b32.xlu1 %v1039_v24, %s938_s26 }
 0x529   :  { %v554_v12 = vpop.permute.xlu1 %553 }
 0x52a   :  { %v556_v13 = vsel %vm285_vm3, %v1006_v36, %v554_v12 }
 0x52b   :  { %862 = vmatmul.mubr.msk.f32.vlgmr.msra.gmra.mxu1 %vm150_vm2, %v556_v13 }
 0x52d   :  { %v722_v24 = vpop.permute.xlu1 %721 }
 0x531   :  { %v734_v31 = vpop.permute.xlu1 %733 }
 0x5eb   :  { %v630_v19 = vpop.f32.mrf.mxu1 }
 0x5ec   :  { %v631_v20 = vadd.f32 %v762_v18, %v630_v19 }
 0x5ed   :  { %v863_v36 = vpop.f32.mrf.mxu1 }
 0x5ee   :  { %902 = vtanh.f32 %v631_v20 }
 0x5fb   :  { %v903_v21 = vpop.eup %902 }
 0x5fc   :  { %873 = vmatmul.mubr.msk.f32.vlgmr.msra.gmra.mxu0 %vm285_vm3, %v903_v21 }
 0x6bc   :  { %v708_v25 = vpop.f32.mrf.mxu0 }
 0x6bd   :  { %v709_v26 = vadd.f32 %v764_v23, %v708_v25 }
 0x6be   :  { %v874_v27 = vpop.f32.mrf.mxu0 }
 0x6bf   :  { %v737_v29 = vsel %vm736_vm8, %v709_v26, %v717_v22 }
 0x6c0   :  { %v739_v30 = vsel %vm738_vm9, %v737_v29, %v722_v24 }
 0x6c1   :  { %v741_v32 = vsel %vm740_vm10, %v739_v30, %v728_v0 }
 0x6c2   :  { %v743_v33 = vsel %vm742_vm11, %v741_v32, %v734_v31 }
 0x6c3   :  { %745 = vst.msk [vmem:[%s1075_s2] sm:$0x3] %vm744_vm12, %v743_v33 }
 0x6c4   :  { %750 = vsyncpa [#allocation3], 1 }

</bundles_post_ra>
